<compile_context>
chip_gen: v5e
topology: v5e:2x2
jax: 0.10.0
libtpu: 0.0.40
codegen_flags: <defaults>
</compile_context>

<pallas_src>
import functools
import math

import jax
import jax.numpy as jnp
from jax.experimental import pallas as pl
from jax.experimental.pallas import tpu as pltpu

EPS = 1e-09
TEMP = 0.66
NUM_ATTR = 312
_SUBLANE = 8


def _round_up(x, m):
    return ((x + m - 1) // m) * m


def _cdiv(a, b):
    return -(-a // b)


def _decoder_attr_kernel(z_ref, w_ref, b_ref, attr_ref, pred_ref, loss_ref):
    # Linear: z @ W + b.  f32 on the MXU: K = zShared_dim is tiny, so f32 costs
    # nothing here and matches the PyTorch f32 nn.Linear exactly.
    y = jnp.dot(z_ref[...], w_ref[...], preferred_element_type=jnp.float32)
    y = y + b_ref[...]                               # (blk, A) + (1, A)

    # pred_labels = logsigmoid(y + EPS), numerically stable form.
    v = y + EPS
    e = jnp.exp(-jnp.abs(v))                         # EUP exp (reused below)
    x = jnp.minimum(v, 0.0) - jnp.log1p(e)           # logsigmoid(v)  (<= 0 always)
    pred_ref[...] = x.astype(pred_ref.dtype)

    # F.binary_cross_entropy_with_logits(x, t, 'none') = max(x,0) - x*t + log1p(exp(-|x|)).
    # NOTE: the simplification below relies on x = logsigmoid(.) <= 0, so
    #   max(x,0) == 0, |x| == -x  =>  bce = log1p(exp(x)) - x*t,
    # and exp(x) = sigmoid(v), rebuilt from the already-computed e = exp(-|v|)
    # (saves one EUP exp per element; the approx reciprocal is a cheap vrcp).
    sig = jnp.where(v <= 0.0, e, 1.0) * pl.reciprocal(1.0 + e, approx=True)
    t = attr_ref[...].astype(jnp.float32)
    bce = jnp.log1p(sig) - x * t

    loss_ref[...] = jnp.sum(bce, axis=1, keepdims=True)   # (blk, 1)


@functools.partial(jax.jit, static_argnames=("block_b", "pred_dtype", "attr_dtype"))
def decoder_attr_pallas(z_keys, w, b, attributes, *, block_b=1024,
                        pred_dtype=jnp.bfloat16, attr_dtype=jnp.bfloat16):
    """Fused decoder for all shared keys.

    z_keys:     (NK, B, D) float32
    w:          (D, A)     float32   (pre-transposed Linear weight)
    b:          (1, A)     float32
    attributes: (B, A)     float32   (binary {0,1} targets; attr_dtype=bf16 is exact.
                                      TODO(synk): gate attr_dtype=f32 for soft labels)
    returns     pred (NK, B, A) pred_dtype, loss (NK, B) float32
    """
    nk, bsz, d = z_keys.shape
    a = w.shape[1]

    # Balanced batch tiling: minimize padding instead of padding up to block_b.
    b8 = _round_up(bsz, _SUBLANE)
    nb = max(1, _cdiv(b8, block_b))
    blk = _round_up(_cdiv(b8, nb), _SUBLANE)
    b_pad = _round_up(bsz, blk)
    nb = b_pad // blk

    zp = z_keys.astype(jnp.float32)
    attrp = attributes.astype(attr_dtype)
    if b_pad != bsz:
        zp = jnp.pad(zp, ((0, 0), (0, b_pad - bsz), (0, 0)))
        attrp = jnp.pad(attrp, ((0, b_pad - bsz), (0, 0)))
    wp = w.astype(jnp.float32)
    bp = b.reshape(1, a).astype(jnp.float32)

    # Batch axis parallel (megacore sharding); key axis innermost so the attributes
    # tile stays VMEM-resident across keys.  If there is only one batch block, make
    # the key axis parallel instead so both v7x TensorCores still get work.
    key_sem = "parallel" if nb == 1 else "arbitrary"

    pred, loss = pl.pallas_call(
        _decoder_attr_kernel,
        out_shape=(
            jax.ShapeDtypeStruct((nk, b_pad, a), pred_dtype),
            jax.ShapeDtypeStruct((nk, b_pad, 1), jnp.float32),
        ),
        grid=(nb, nk),
        in_specs=[
            # z: blocked over (key, batch); leading key dim squeezed out of the Ref
            pl.BlockSpec((None, blk, d), lambda i, k: (k, i, 0)),
            # weight / bias: constant block index -> DMA'd once, VMEM-resident
            pl.BlockSpec((d, a), lambda i, k: (0, 0)),
            pl.BlockSpec((1, a), lambda i, k: (0, 0)),
            # attributes: shared across keys, blocked over batch only; since the key
            # axis iterates fastest, this block index is unchanged step-to-step.
            pl.BlockSpec((blk, a), lambda i, k: (i, 0)),
        ],
        out_specs=(
            pl.BlockSpec((None, blk, a), lambda i, k: (k, i, 0)),
            pl.BlockSpec((None, blk, 1), lambda i, k: (k, i, 0)),
        ),
        compiler_params=pltpu.CompilerParams(
            dimension_semantics=("parallel", key_sem),
        ),
    )(zp, wp, bp, attrp)

    if b_pad != bsz:
        pred = pred[:, :bsz]
        loss = loss[:, :bsz]
    return pred, loss[..., 0]


class DecoderAttr:
    """JAX/Pallas port of the PyTorch DecoderAttr module (forward hot path)."""

    def __init__(self, seed, zShared_dim, num_hidden):
        self.digit_temp = TEMP
        self.seed = seed
        self.zShared_dim = zShared_dim
        # kaiming_init on nn.Linear(zShared_dim, 312): kaiming-normal weight
        # (fan_in mode, relu gain => std = sqrt(2/fan_in)), zero bias.
        key = jax.random.PRNGKey(seed)
        std = math.sqrt(2.0 / zShared_dim)
        self.weight = jax.random.normal(key, (zShared_dim, NUM_ATTR), jnp.float32) * std
        self.bias = jnp.zeros((1, NUM_ATTR), jnp.float32)

    def forward(self, attributes, shared, q, train=True):
        # TODO(synk): probtorch.Trace / p.normal(...) bookkeeping (sample registration,
        # standard-normal log-prob accumulation) has no Pallas equivalent; we return the
        # decoded pred_labels and the per-sample attr losses keyed like the Trace entries.
        keys = list(shared.keys())
        # Fuse ALL shared keys into one pallas_call (weight/bias/attributes are
        # identical across keys; z tensors are stacked along a leading axis).
        z_stack = jnp.stack(
            [q[shared[k]].reshape(-1, self.zShared_dim) for k in keys], axis=0
        )  # (NK, B, D)   (num_samples == 1 squeezed, as in the torch .squeeze(0))
        pred, loss = decoder_attr_pallas(z_stack, self.weight, self.bias, attributes)

        out = {"pred_labels": {}, "losses": {}}
        for idx, shared_from in enumerate(keys):
            out["pred_labels"][shared_from] = pred[idx]
            out["losses"]["attr_" + shared_from] = loss[idx]
        return out


def _reference(z2d, w, b, attributes):
    # Pure-JAX f32 reference with the exact PyTorch formulas.
    y = jnp.dot(z2d, w, preferred_element_type=jnp.float32) + b
    x = jax.nn.log_sigmoid(y + EPS)
    bce = jnp.maximum(x, 0.0) - x * attributes + jnp.log1p(jnp.exp(-jnp.abs(x)))
    return x, jnp.sum(bce, axis=1)


if __name__ == "__main__":
    B = 8            # batch
    D = 32           # zShared_dim
    NS = 1           # num_samples (squeezed, as in the torch .squeeze(0))

    key = jax.random.PRNGKey(0)
    k_z1, k_z2, k_attr = jax.random.split(key, 3)

    model = DecoderAttr(seed=0, zShared_dim=D, num_hidden=256)

    attributes = (jax.random.uniform(k_attr, (B, NUM_ATTR)) > 0.5).astype(jnp.float32)
    q = {
        "sharedB": jax.random.normal(k_z1, (NS, B, D), jnp.float32),
        "sharedA": jax.random.normal(k_z2, (NS, B, D), jnp.float32),
    }
    shared = {"own": "sharedB", "cross": "sharedA"}

    out = model.forward(attributes, shared, q)
    jax.block_until_ready(out)

    # correctness check against a pure-JAX f32 reference
    for shared_from, shared_name in shared.items():
        ref_pred, ref_loss = _reference(
            q[shared_name].reshape(-1, D), model.weight, model.bias, attributes
        )
        pred = out["pred_labels"][shared_from].astype(jnp.float32)
        loss = out["losses"]["attr_" + shared_from]
        # pred is stored in bf16 -> tolerance covers the bf16 rounding (~0.4% rel)
        assert jnp.allclose(pred, ref_pred, atol=1e-3, rtol=1e-2)
        # loss is f32 throughout (approx reciprocal only) -> tight tolerance
        assert jnp.allclose(loss, ref_loss, atol=1e-2, rtol=1e-3)

    print("KERNEL_OK")
</pallas_src>

<mosaic_0001>
module attributes {stable_mosaic.version = 11 : i64} {
  func.func @_decoder_attr_kernel(%arg0: i32, %arg1: i32, %arg2: memref<1x8x32xf32, #tpu.memory_space<vmem>>, %arg3: memref<32x312xf32, #tpu.memory_space<vmem>>, %arg4: memref<1x312xf32, #tpu.memory_space<vmem>>, %arg5: memref<8x312xbf16, #tpu.memory_space<vmem>>, %arg6: memref<1x8x312xbf16, #tpu.memory_space<vmem>>, %arg7: memref<1x8x1xf32, #tpu.memory_space<vmem>>) attributes {dimension_semantics = [#tpu.dimension_semantics<parallel>, #tpu.dimension_semantics<parallel>], iteration_bounds = array<i64: 1, 2>, scalar_prefetch = 0 : i64, scratch_operands = 0 : i64, tpu.core_type = #tpu.core_type<tc>, window_params = [{transform_indices = @transform_0, window_bounds = array<i64: 1, 8, 32>}, {pipeline_mode = #tpu.pipeline_mode<synchronous>, transform_indices = @transform_1, window_bounds = array<i64: 32, 312>}, {pipeline_mode = #tpu.pipeline_mode<synchronous>, transform_indices = @transform_2, window_bounds = array<i64: 1, 312>}, {transform_indices = @transform_3, window_bounds = array<i64: 8, 312>}, {transform_indices = @transform_4, window_bounds = array<i64: 1, 8, 312>}, {transform_indices = @transform_5, window_bounds = array<i64: 1, 8, 1>}]} {
    %c0 = arith.constant 0 : index
    %c0_0 = arith.constant 0 : index
    %c0_1 = arith.constant 0 : index
    %0 = vector.load %arg2[%c0, %c0_0, %c0_1] : memref<1x8x32xf32, #tpu.memory_space<vmem>>, vector<1x8x32xf32>
    %1 = vector.shape_cast %0 : vector<1x8x32xf32> to vector<8x32xf32>
    %c0_2 = arith.constant 0 : index
    %c0_3 = arith.constant 0 : index
    %2 = vector.load %arg3[%c0_2, %c0_3] : memref<32x312xf32, #tpu.memory_space<vmem>>, vector<32x312xf32>
    %cst = arith.constant dense<0.000000e+00> : vector<8x312xf32>
    %3 = tpu.matmul %1, %2, %cst {dimension_numbers = #tpu.dot_dimension_numbers<[1], [0], [0], [1], [0, 0, 1, 1], [], []>} : vector<8x32xf32>, vector<32x312xf32>, vector<8x312xf32> -> vector<8x312xf32>
    %c0_4 = arith.constant 0 : index
    %c0_5 = arith.constant 0 : index
    %4 = vector.load %arg4[%c0_4, %c0_5] : memref<1x312xf32, #tpu.memory_space<vmem>>, vector<1x312xf32>
    %5 = vector.broadcast %4 : vector<1x312xf32> to vector<8x312xf32>
    %6 = arith.addf %3, %5 : vector<8x312xf32>
    %cst_6 = arith.constant 9.99999971E-10 : f32
    %7 = vector.broadcast %cst_6 : f32 to vector<8x312xf32>
    %8 = arith.addf %6, %7 : vector<8x312xf32>
    %9 = math.absf %8 : vector<8x312xf32>
    %cst_7 = arith.constant 0.000000e+00 : f32
    %10 = vector.broadcast %cst_7 : f32 to vector<8x312xf32>
    %11 = arith.subf %10, %9 : vector<8x312xf32>
    %12 = math.exp %11 : vector<8x312xf32>
    %cst_8 = arith.constant 0.000000e+00 : f32
    %13 = vector.broadcast %cst_8 : f32 to vector<8x312xf32>
    %14 = arith.minimumf %8, %13 : vector<8x312xf32>
    %15 = math.log1p %12 : vector<8x312xf32>
    %16 = arith.subf %14, %15 : vector<8x312xf32>
    %17 = arith.truncf %16 : vector<8x312xf32> to vector<8x312xbf16>
    %c0_9 = arith.constant 0 : index
    %c0_10 = arith.constant 0 : index
    %c0_11 = arith.constant 0 : index
    %18 = vector.load %arg6[%c0_9, %c0_10, %c0_11] : memref<1x8x312xbf16, #tpu.memory_space<vmem>>, vector<1x8x312xbf16>
    %19 = vector.shape_cast %18 : vector<1x8x312xbf16> to vector<8x312xbf16>
    %20 = vector.shape_cast %17 : vector<8x312xbf16> to vector<1x8x312xbf16>
    tpu.vector_store %arg6[%c0_9, %c0_10, %c0_11], %20 {strides = array<i32>} : memref<1x8x312xbf16, #tpu.memory_space<vmem>>, vector<1x8x312xbf16>,
    %cst_12 = arith.constant 0.000000e+00 : f32
    %21 = vector.broadcast %cst_12 : f32 to vector<8x312xf32>
    %22 = arith.cmpf ole, %8, %21 : vector<8x312xf32>
    %cst_13 = arith.constant 1.000000e+00 : f32
    %23 = vector.broadcast %cst_13 : f32 to vector<8x312xf32>
    %24 = arith.select %22, %12, %23 : vector<8x312xi1>, vector<8x312xf32>
    %cst_14 = arith.constant 1.000000e+00 : f32
    %25 = vector.broadcast %cst_14 : f32 to vector<8x312xf32>
    %26 = arith.addf %25, %12 : vector<8x312xf32>
    %27 = tpu.reciprocal %26 {approx = true} : vector<8x312xf32> -> vector<8x312xf32>
    %28 = arith.mulf %24, %27 : vector<8x312xf32>
    %c0_15 = arith.constant 0 : index
    %c0_16 = arith.constant 0 : index
    %29 = vector.load %arg5[%c0_15, %c0_16] : memref<8x312xbf16, #tpu.memory_space<vmem>>, vector<8x312xbf16>
    %30 = arith.extf %29 : vector<8x312xbf16> to vector<8x312xf32>
    %31 = math.log1p %28 : vector<8x312xf32>
    %32 = arith.mulf %16, %30 : vector<8x312xf32>
    %33 = arith.subf %31, %32 : vector<8x312xf32>
    %cst_17 = arith.constant dense<0.000000e+00> : vector<8xf32>
    %34 = vector.multi_reduction <add>, %33, %cst_17 [1] : vector<8x312xf32> to vector<8xf32>
    %35 = vector.shape_cast %34 : vector<8xf32> to vector<8x1xf32>
    %c0_18 = arith.constant 0 : index
    %c0_19 = arith.constant 0 : index
    %c0_20 = arith.constant 0 : index
    %36 = vector.load %arg7[%c0_18, %c0_19, %c0_20] : memref<1x8x1xf32, #tpu.memory_space<vmem>>, vector<1x8x1xf32>
    %37 = vector.shape_cast %36 : vector<1x8x1xf32> to vector<8x1xf32>
    %38 = vector.shape_cast %35 : vector<8x1xf32> to vector<1x8x1xf32>
    tpu.vector_store %arg7[%c0_18, %c0_19, %c0_20], %38 {strides = array<i32>} : memref<1x8x1xf32, #tpu.memory_space<vmem>>, vector<1x8x1xf32>,
    return
  }
  func.func @transform_0(%arg0: i32, %arg1: i32) -> (i32, i32, i32) {
    %c0_i32 = arith.constant 0 : i32
    %c0_i32_0 = arith.constant 0 : i32
    return %arg1, %arg0, %c0_i32 : i32, i32, i32
  }
  func.func @transform_1(%arg0: i32, %arg1: i32) -> (i32, i32) {
    %c0_i32 = arith.constant 0 : i32
    %c0_i32_0 = arith.constant 0 : i32
    %c0_i32_1 = arith.constant 0 : i32
    return %c0_i32, %c0_i32_0 : i32, i32
  }
  func.func @transform_2(%arg0: i32, %arg1: i32) -> (i32, i32) {
    %c0_i32 = arith.constant 0 : i32
    %c0_i32_0 = arith.constant 0 : i32
    %c0_i32_1 = arith.constant 0 : i32
    return %c0_i32, %c0_i32_0 : i32, i32
  }
  func.func @transform_3(%arg0: i32, %arg1: i32) -> (i32, i32) {
    %c0_i32 = arith.constant 0 : i32
    %c0_i32_0 = arith.constant 0 : i32
    return %arg0, %c0_i32 : i32, i32
  }
  func.func @transform_4(%arg0: i32, %arg1: i32) -> (i32, i32, i32) {
    %c0_i32 = arith.constant 0 : i32
    %c0_i32_0 = arith.constant 0 : i32
    return %arg1, %arg0, %c0_i32 : i32, i32, i32
  }
  func.func @transform_5(%arg0: i32, %arg1: i32) -> (i32, i32, i32) {
    %c0_i32 = arith.constant 0 : i32
    %c0_i32_0 = arith.constant 0 : i32
    return %arg1, %arg0, %c0_i32 : i32, i32, i32
  }
}

</mosaic_0001>

<bundles_post_ra>
// kernel: decoder_attr_pallas.1
= control target key start
LH: loop header
LB: loop body
LE: loop exit
PB: predicated region body
PF: predicated region fallthrough
CT: control target
= control target key end

     0   :  { %11 = vsyncpa [#allocation3], 0  ;;  %s1072_s0 = inlined_call_operand.vmem [shape: f32[2,8,32], index: 0, kind: input, shape index: {}]   ;;  %s1073_s1 = inlined_call_operand.hbm [shape: f32[32,312], index: 1, kind: input, shape index: {}]   ;;  %s1074_s2 = inlined_call_operand.vmem [shape: f32[1,312], index: 2, kind: input, shape index: {}]   ;;  %s1075_s3 = inlined_call_operand.vmem [shape: bf16[8,312], index: 3, kind: input, shape index: {}]   ;;  %s1076_s4 = inlined_call_operand.hbm [shape: bf16[2,8,312], index: 4, kind: output, shape index: {0}]   ;;  %s1077_s5 = inlined_call_operand.vmem [shape: f32[2,8,1], index: 5, kind: output, shape index: {1}]  }
   0x1   :  { %12 = vsyncpa [#allocation4], 0 }
   0x2   :  { %14 = vsyncpa [#allocation4 + $0x1], 0  ;;  %s917_s18 = smov 0   ;;  %s919_s19 = smov 0  }
   0x3   :  { %s921_s20 = smov 0   ;;  %s923_s21 = smov 0  }
   0x4   :  { %s925_s22 = smov 0   ;;  %s927_s23 = smov 0  }
   0x5 LB: > { %s660_s24 = sadd.s32 4294967295, %s882_s23   ;;  %s661_s25 = sadd.s32 4294967294, %s882_s23   ;;  %s882_s23 = sphi %s927_s23, %s20_s23   ;;  %s878_s22 = sphi %s925_s22, %s1088_s22   ;;  %s874_s21 = sphi %s923_s21, %s1087_s21   ;;  %s870_s20 = sphi %s921_s20, %s1086_s20   ;;  %s866_s19 = sphi %s919_s19, %s1085_s19   ;;  %s862_s18 = sphi %s917_s18, %s1084_s18  }
   0x6   : > { %s29_s26 = sadd.s32 1, %s878_s22  ;;  %s137_s27 = sadd.s32 1, %s870_s20 }
   0x7   : > { %p30_p0 = scmp.ge.s32.totalorder %s29_s26, 2  ;;  %p147_p1 = scmp.ne.s32.totalorder %s870_s20, %s866_s19 }
   0x8   : > { %p148_p2 = scmp.eq.s32.totalorder %s660_s24, 1  ;;  %p153_p3 = scmp.ne.s32.totalorder %s866_s19, %s862_s18 }
   0x9   : > { %s1090_s26 = smov (%p30_p0, %s29_s26), 0  ;;  %p154_p5 = scmp.eq.s32.totalorder %s661_s25, 1 }
   0xa   : > { %p957_p4 = por %p148_p2, %p147_p1  ;;  %s132_s29 = ssub.s32 %s878_s22, %s1090_s26 }
   0xb   : > { %p662_p6 = scmp.ge.s32.totalorder %s882_s23, 1  ;;  %p135_p7 = scmp.eq.s32.totalorder %s132_s29, 0 }
   0xc   : > { %p964_p8 = por %p154_p5, %p153_p3  ;;  %p189_p9 = scmp.lt.s32.totalorder %s882_s23, 3 }
   0xd   : > { %s970_s6 = scalar_select %p135_p7, %s870_s20, %s137_s27  }
   0xe   : > { %p190_p10 = pnand %p662_p6, %p189_p9  ;;  %p692_p11 = scmp.eq.s32.totalorder %s660_s24, 0 }
   0xf   : > { %s200_s9 = sshll.u32 %s1073_s1, 4  ;;  %s884_s10 = smov [#allocation2]   ;;  %s201_s9 = int_to_ptr.hbm [resolvable:$true] %s200_s9 }
  0x10   : > { %p684_p12 = pneg %p190_p10  ;;  %s202_s11 = sshll.u32 %s884_s10, 4  ;;  %s203_s11 = int_to_ptr.vmem [resolvable:$true] %s202_s11 }
  0x11   : > { %s885_s12 = smov 384   ;;  %s886_s13 = smov 24  }
  0x12   : > { %p685_p13 = pnand %p692_p11, %p684_p12  ;;  %239 = sbr.rel (%p190_p10) target bundleno = 333 (0x14d), region = 36 }
  0x14   : > { %687 = dma.hbm_to_vmem [thread:$0]  (!%p685_p13), %s201_s9, 1536, %s203_s11, [#allocation3], %s885_s12, %s885_s12, %s886_s13  }
  0x17   : > { %853 = dma.done.wait (%p692_p11), [#allocation3], 1536  }
  0x18   : > { %855 = vsyncadd (%p692_p11), [#allocation3], 4294965760  ;;  %p282_p0 = scmp.lt.s32.totalorder %s874_s21, 1  ;;  %v311_v0 = vld [vmem:[#allocation2 + $0x48] sm:$0xff]  ;;  %v312_v1 = vld [vmem:[#allocation2 + $0x50] sm:$0xff]  ;;  %vm322_vm0 = vcmask 261120  }
  0x19   : > { %v313_v2 = vld [vmem:[#allocation2 + $0x58] sm:$0xff]  ;;  %338 = vmatpush.msra.mxu0 %v311_v0  ;;  %358 = vmatpush.msra.mxu1 %v312_v1  ;;  %v308_v3 = vld [vmem:[#allocation2 + $0x30] sm:$0xff]  ;;  %v310_v5 = vld [vmem:[#allocation2 + $0x40] sm:$0xff]  ;;  %s270_s29 = sand.u32 1, %s866_s19   ;;  %s677_s11 = smul.u32 12, %s874_s21  ;;  %vm437_vm7 = vcmask 453632  }
  0x1a   : > { %s977_s14 = scalar_select %p282_p0, %s874_s21, 1  ;;  %v309_v4 = vld [vmem:[#allocation2 + $0x38] sm:$0xff]  ;;  %378 = vmatpush.msra.mxu2 %v313_v2  ;;  %v306_v7 = vld [vmem:[#allocation2 + $0x20] sm:$0xff]  ;;  %v307_v8 = vld [vmem:[#allocation2 + $0x28] sm:$0xff] }
  0x1b   : > { %v305_v6 = vld [vmem:[#allocation2 + $0x18] sm:$0xff]  ;;  %339 = vmatpush.msra.mxu0 %v308_v3  ;;  %359 = vmatpush.msra.mxu1 %v309_v4  ;;  %v302_v9 = vld [vmem:[#allocation2] sm:$0xff]  ;;  %v303_v10 = vld [vmem:[#allocation2 + $0x8] sm:$0xff]  ;;  %s676_s7 = smul.u32 12, %s270_s29  ;;  %s501_s27 = scalar_lea.sflag [#allocation4], %s270_s29 }
  0x1c   : > { %s668_s15 = sshll.u32 %s977_s14, 3  ;;  %379 = vmatpush.msra.mxu2 %v310_v5  ;;  %v304_v11 = vld [vmem:[#allocation2 + $0x10] sm:$0xff]  ;;  %v314_v13 = vld [vmem:[%s1074_s2] sm:$0x7]  ;;  %s820_s12 = scalar_lea.hbm %s1076_s4, 24 }
  0x1d   : > { %s288_s24 = scalar_lea.vmem %s1072_s0, %s668_s15  ;;  %340 = vmatpush.msra.mxu0 %v305_v6  ;;  %360 = vmatpush.msra.mxu1 %v306_v7  ;;  %v316_v14 = vperm.slane %v314_v13, 0  ;;  %v317_v15 = vperm.slane %v314_v13, 1  ;;  %v318_v22 = vperm.slane %v314_v13, 2  ;;  %s1000_s8 = scalar_lea.vmem [#allocation5], %s676_s7 }
  0x1e   : > { %v301_v12 = vld [vmem:[%s288_s24] sm:$0xff]  ;;  %380 = vmatpush.msra.mxu2 %v307_v8  ;;  %s521_s24 = scalar_lea.hbm %s1076_s4, %s677_s11  ;;  %s523_s21 = sshll.u32 %s1000_s8, 4  ;;  %s524_s21 = int_to_ptr.vmem [resolvable:$true] %s523_s21 }
  0x1f   : > { %341 = vmatpush.msra.mxu0 %v302_v9  ;;  %361 = vmatpush.msra.mxu1 %v303_v10  ;;  %s525_s25 = sshll.u32 %s521_s24, 4  ;;  %s526_s25 = int_to_ptr.hbm [resolvable:$true] %s525_s25 }
  0x20   : > { %381 = vmatpush.msra.mxu2 %v304_v11  ;;  %670 = vmatmul.msk.f32.vlgmr.msra.gmra.mxu0 %vm322_vm0, %v301_v12  ;;  %s814_s7 = sshra.s32 %s526_s25, 4  ;;  %s815_s7 = int_to_ptr.hbm [resolvable:$true] %s814_s7 }
  0x21   : > { %671 = vmatmul.msk.f32.vlgmr.msra.gmra.mxu1 %vm322_vm0, %v301_v12  ;;  %672 = vmatmul.msk.f32.vlgmr.msra.gmra.mxu2 %vm322_vm0, %v301_v12  ;;  %s816_s9 = scalar_lea.hbm %s815_s7, 12  ;;  %p821_p5 = scmp.lt.s32.totalorder %s815_s7, %s1076_s4 }
  0x22   : > { %p817_p1 = scmp.ne.s32.totalorder %s815_s7, %s816_s9  ;;  %p822_p6 = scmp.lt.s32.totalorder %s820_s12, %s816_s9 }
  0x24   : > { %p818_p2 = pnand %p817_p1, %p957_p4  ;;  %p823_p7 = por %p822_p6, %p821_p5 }
  0x26   : > { %p819_p3 = pneg %p818_p2 }
  0x28   : > { %p824_p9 = pnand %p823_p7, %p819_p3 }
  0x9d   : > { %v343_v16 = vpop.f32.mrf.mxu0 }
  0x9e   : > { %v344_v17 = vadd.f32 %v343_v16, %v316_v14  ;;  %v363_v18 = vpop.f32.mrf.mxu1 }
  0x9f   : > { %v364_v19 = vadd.f32 %v363_v18, %v317_v15  ;;  %v454_v18 = vld [vmem:[%s1075_s3] sm:$0xff] }
  0xa0   : > { %v386_v20 = vadd.f32 1e-09, %v344_v17 }
  0xa1   : > { %v387_v21 = vadd.f32 1e-09, %v364_v19 }
  0xa2   : > { %v389_v23 = vand.u32 2147483647, %v386_v20  ;;  %vm439_vm1 = vcmp.le.f32.partialorder %v386_v20, 0.0  ;;  %v401_v47 = vmin.f32 %v386_v20, 0.0 }
  0xa3   : > { %v390_v24 = vand.u32 2147483647, %v387_v21  ;;  %v402_v53 = vmin.f32 %v387_v21, 0.0  ;;  %vm440_vm3 = vcmp.le.f32.partialorder %v387_v21, 0.0 }
  0xa4   : > { %v392_v25 = vsub.f32 0.0, %v389_v23  ;;  %v383_v26 = vpop.f32.mrf.mxu2 }
  0xa5   : > { %v393_v27 = vsub.f32 0.0, %v390_v24  ;;  %v384_v28 = vadd.f32 %v383_v26, %v318_v22 }
  0xa6   : > { %v395_v29 = vmul.f32 1.442695, %v392_v25 }
  0xa7   : > { %v397_v30 = vmul.f32 1.442695, %v393_v27  ;;  %v988_v31 = vadd.f32 1e-09, %v384_v28 }
  0xa8   : > { %746 = vpow2.f32 %v395_v29  ;;  %v455_v29 = vld [vmem:[%s1075_s3 + $0x8] sm:$0xf] }
  0xa9   : > { %748 = vpow2.f32 %v397_v30  ;;  %v391_v32 = vand.u32 2147483647, %v988_v31  ;;  %vm441_vm5 = vcmp.le.f32.partialorder %v988_v31, 0.0  ;;  %v403_v15 = vmin.f32 %v988_v31, 0.0 }
  0xaa   : > { %v456_v30 = vunpack.c.l.bf16 %v454_v18  ;;  %v457_v31 = vunpack.c.h.bf16 %v454_v18 }
  0xab   : > { %v394_v33 = vsub.f32 0.0, %v391_v32 }
  0xad   : > { %v399_v39 = vmul.f32 1.442695, %v394_v33 }
  0xae   : > { %v747_v34 = vpop.eup %746 }
  0xaf   : > { %v749_v35 = vpop.eup %748  ;;  %v404_v36 = vadd.f32 1.0, %v747_v34  ;;  %v407_v37 = vmul.f32 -0.5, %v747_v34  ;;  %v410_v42 = vand.u32 2147483647, %v747_v34  ;;  %v442_v50 = vsel %vm439_vm1, %v747_v34, 1.0 }
  0xb0   : > { %v413_v38 = vadd.f32 1.0, %v749_v35  ;;  %v416_v40 = vmul.f32 -0.5, %v749_v35  ;;  %v419_v45 = vand.u32 2147483647, %v749_v35  ;;  %v443_v58 = vsel %vm440_vm3, %v749_v35, 1.0 }
  0xb1   : > { %750 = vlog2.f32 %v404_v36  ;;  %v408_v41 = vadd.f32 1.0, %v407_v37  ;;  %vm411_vm2 = vcmp.lt.f32.partialorder %v410_v42, 0.0004427343 }
  0xb2   : > { %752 = vrcp.f32 %v404_v36  ;;  %v417_v43 = vadd.f32 1.0, %v416_v40  ;;  %vm420_vm4 = vcmp.lt.f32.partialorder %v419_v45, 0.0004427343 }
  0xb3   : > { %754 = vlog2.f32 %v413_v38  ;;  %v409_v49 = vmul.f32 %v747_v34, %v408_v41 }
  0xb4   : > { %756 = vrcp.f32 %v413_v38  ;;  %v418_v57 = vmul.f32 %v749_v35, %v417_v43  ;;  %v458_v38 = vunpack.c.l.bf16 %v455_v29 }
  0xb5   : > { %758 = vpow2.f32 %v399_v39 }
  0xb7   : > { %v751_v44 = vpop.eup %750 }
  0xb8   : > { %v753_v46 = vpop.eup %752  ;;  %v406_v48 = vmul.f32 0.6931472, %v751_v44 }
  0xb9   : > { %v755_v51 = vpop.eup %754  ;;  %v992_v52 = vmul.f32 %v753_v46, %v442_v50 }
  0xba   : > { %v757_v54 = vpop.eup %756  ;;  %v412_v55 = vsel %vm411_vm2, %v409_v49, %v406_v48  ;;  %v415_v56 = vmul.f32 0.6931472, %v755_v51 }
  0xbb   : > { %v759_v59 = vpop.eup %758  ;;  %v996_v60 = vsub.f32 %v401_v47, %v412_v55  ;;  %v452_v61 = vmul.f32 %v757_v54, %v443_v58  ;;  %v459_v62 = vadd.f32 1.0, %v992_v52  ;;  %v462_v8 = vmul.f32 -0.5, %v992_v52 }
  0xbc   : > { %v421_v63 = vsel %vm420_vm4, %v418_v57, %v415_v56  ;;  %v422_v0 = vadd.f32 1.0, %v759_v59  ;;  %v425_v2 = vmul.f32 -0.5, %v759_v59  ;;  %v428_v7 = vand.u32 2147483647, %v759_v59 }
  0xbd   : > { %v432_v1 = vsub.f32 %v402_v53, %v421_v63  ;;  %760 = vlog2.f32 %v459_v62  ;;  %v468_v3 = vadd.f32 1.0, %v452_v61  ;;  %v471_v9 = vmul.f32 -0.5, %v452_v61 }
  0xbe   : > { %762 = vrcp.f32 %v422_v0  ;;  %v426_v5 = vadd.f32 1.0, %v425_v2  ;;  %v444_v11 = vsel %vm441_vm5, %v759_v59, 1.0  ;;  %vm429_vm6 = vcmp.lt.f32.partialorder %v428_v7, 0.0004427343 }
  0xbf   : > { %v434_v4 = vpack.c.bf16 %v432_v1, %v996_v60  ;;  %764 = vlog2.f32 %v422_v0  ;;  %v463_v19 = vadd.f32 1.0, %v462_v8  ;;  %v472_v20 = vadd.f32 1.0, %v471_v9 }
  0xc0   : > { %766 = vlog2.f32 %v468_v3  ;;  %v427_v17 = vmul.f32 %v759_v59, %v426_v5  ;;  %v465_v23 = vand.u32 2147483647, %v992_v52  ;;  %v474_v24 = vand.u32 2147483647, %v452_v61 }
  0xc1   : > { %436 = vst [vmem:[%s1000_s8] sm:$0xff] %v434_v4  ;;  %v464_v33 = vmul.f32 %v463_v19, %v992_v52  ;;  %v473_v34 = vmul.f32 %v472_v20, %v452_v61  ;;  %v486_v42 = vmul.f32 %v456_v30, %v996_v60  ;;  %v487_v43 = vmul.f32 %v457_v31, %v432_v1 }
  0xc2   : > { %vm1019_vm8 = vcmp.lt.f32.partialorder %v465_v23, 0.0004427343  ;;  %vm1023_vm9 = vcmp.lt.f32.partialorder %v474_v24, 0.0004427343 }
  0xc3   : > { %v761_v6 = vpop.eup %760 }
  0xc4   : > { %v763_v10 = vpop.eup %762  ;;  %v461_v27 = vmul.f32 0.6931472, %v761_v6 }
  0xc5   : > { %v765_v12 = vpop.eup %764  ;;  %v453_v13 = vmul.f32 %v763_v10, %v444_v11 }
  0xc6   : > { %v767_v14 = vpop.eup %766  ;;  %v424_v16 = vmul.f32 0.6931472, %v765_v12  ;;  %v467_v39 = vsel %vm1019_vm8, %v464_v33, %v461_v27 }
  0xc7   : > { %v477_v21 = vadd.f32 1.0, %v453_v13  ;;  %v480_v25 = vmul.f32 -0.5, %v453_v13  ;;  %v470_v28 = vmul.f32 0.6931472, %v767_v14  ;;  %v483_v41 = vand.u32 2147483647, %v453_v13 }
  0xc8   : > { %v430_v22 = vsel %vm429_vm6, %v427_v17, %v424_v16 }
  0xc9   : > { %v433_v26 = vsub.f32 %v403_v15, %v430_v22  ;;  %768 = vlog2.f32 %v477_v21  ;;  %v481_v37 = vadd.f32 1.0, %v480_v25  ;;  %v476_v40 = vsel %vm1023_vm9, %v473_v34, %v470_v28 }
  0xcb   : > { %v435_v32 = vpack.c.bf16 %v433_v26, %v433_v26 }
  0xcd   : > { %438 = vst.msk [vmem:[%s1000_s8 + $0x8] sm:$0xf] %vm437_vm7, %v435_v32 }
  0xce   : > { %827 = shalt.err (!%p824_p9)
}
  0xcf   : > { %682 = dma.vmem_to_hbm [thread:$0]  (%p957_p4), %s524_s21, 192, %s526_s25, %s501_s27   ;;  %v769_v44 = vpop.eup %768  ;;  %v482_v46 = vmul.f32 %v481_v37, %v453_v13  ;;  %v489_v47 = vsub.f32 %v467_v39, %v486_v42  ;;  %v490_v48 = vsub.f32 %v476_v40, %v487_v43  ;;  %vm484_vm10 = vcmp.lt.f32.partialorder %v483_v41, 0.0004427343 }
  0xd0   : > { %v479_v45 = vmul.f32 0.6931472, %v769_v44  ;;  %v488_v49 = vmul.f32 %v458_v38, %v433_v26  ;;  %vm493_vm11 = vcmask 457728   ;;  %s300_s28 = scalar_lea.vmem %s1077_s5, %s668_s15  ;;  %vm498_vm12 = vcmask 7168  }
  0xd1   : > { %v492_v52 = vadd.f32 %v490_v48, %v489_v47 }
  0xd2   : > { %v485_v50 = vsel %vm484_vm10, %v482_v46, %v479_v45 }
  0xd3   : > { %v491_v51 = vsub.f32 %v485_v50, %v488_v49 }
  0xd5   : > { %v494_v53 = vsel %vm493_vm11, %v491_v51, 0.0 }
  0xd6   : > { %v495_v54 = vadd.f32 %v494_v53, %v492_v52 }
  0xd8   : > { %496 = vadd.xlane.f32.xlu0 %v495_v54 }
 0x14b   : > { %v497_v55 = vpop.xlane.xlu0 %496 }
 0x14c   : > { %499 = vst.msk [vmem:[%s300_s28] sm:$0xff] %vm498_vm12, %v497_v55 }
 0x14d PF: > { %p694_p4 = scmp.ge.s32.totalorder %s882_s23, 2  ;;  %s540_s17 = sand.u32 1, %s862_s18  }
 0x14e   : > { %s541_s24 = scalar_lea.sflag [#allocation4], %s540_s17 }
 0x14f   : > { %p689_p10 = pnand %p694_p4, %p964_p8 }
 0x151   : > { %p690_p11 = pneg %p689_p10 }
 0x153   : > { %857 = dma.done.wait (%p690_p11), %s541_s24, 192  }
 0x154   : > { %859 = vsyncadd (%p690_p11), %s541_s24, 4294967104  ;;  %s20_s23 = sadd.s32 1, %s882_s23   ;;  %s1084_s18 = smov %s866_s19 }
 0x155   : > { %p17_p12 = scmp.ge.s32.totalorder %s20_s23, 4   ;;  %s1085_s19 = smov %s870_s20 }
 0x156   : > { %s1086_s20 = smov %s970_s6  ;;  %s1087_s21 = smov %s878_s22 }
 0x157   : > { %s1088_s22 = smov %s1090_s26  ;;  %19 = sbr.rel (!%p17_p12) target bundleno = 5 (0x5), region = 91 }
 0x15c   :  { %557 = vsyncpa [#allocation3], 1 }
 0x15d   :  { %559 = vsyncpa [#allocation3 + $0x1], 1 }
 0x15e   :  { %560 = vsyncpa [#allocation4], 1 }
 0x15f   :  { %562 = vsyncpa [#allocation4 + $0x1], 1 }

</bundles_post_ra>
